<compile_context>
chip_gen: v7x
topology: tpu7x:2x2x1
jax: 0.10.0
libtpu: 0.0.40
codegen_flags: <defaults>
</compile_context>

<pallas_src>
import functools
import math

import jax
import jax.numpy as jnp
from jax.experimental import pallas as pl
from jax.experimental.pallas import tpu as pltpu


def _round_up(a, b):
    return ((a + b - 1) // b) * b


def _cdiv(a, b):
    return (a + b - 1) // b


def _jnp_forward(point_pos, weight, bias):
    """Pure-JAX reference / small-remainder path. point_pos: (..., 3)."""
    x = point_pos[..., 0:1]
    y = point_pos[..., 1:2]
    z = point_pos[..., 2:3]
    enc = jnp.concatenate(
        [jnp.sin(x), jnp.cos(x), jnp.sin(y), jnp.cos(y), jnp.sin(z), jnp.cos(z)],
        axis=-1,
    )
    return jnp.dot(enc, weight.T, precision=jax.lax.Precision.HIGHEST) + bias


def _packing_plan(feat_ch, n_points):
    """Pick (k, feat_pad): pack k points per 128-lane-aligned output row.

    k satisfies k*feat_ch % 128 == 0 (lane-dense stores) and 3k <= 128, with
    k*feat_ch kept moderate so block-diag MXU MACs/point (6*k*feat_ch) stay
    below the HBM roofline. Prefers k dividing n_points (no ragged remainder).
    Returns feat_pad > feat_ch only on the k == 1 lane-padding fallback.
    """
    if feat_ch % 128 == 0:
        return 1, feat_ch                       # already lane-dense
    if feat_ch <= 128 and feat_ch % 4 == 0:
        base = 128 // math.gcd(feat_ch, 128)    # smallest k with k*feat_ch % 128 == 0
        if base * feat_ch <= 1024:              # keep MXU MACs/pt bounded
            max_k = min(128 // 3, max(base, 512 // feat_ch))
            cands = list(range(base, max_k + 1, base))
            divisors = [c for c in cands if n_points % c == 0]
            return (divisors[-1] if divisors else cands[-1]), feat_ch
    # Fallback (odd feat_ch, or feat_ch not playing nicely with 128): keep the
    # output lane-dense by zero-padding the feature dim to a multiple of 128.
    return 1, _round_up(feat_ch, 128)


def _pos_emb_kernel(pos_ref, w_sin_ref, w_cos_ref, b_ref, out_ref):
    # pos_ref:   (TR, 3k)        k packed points per row: [x0,y0,z0, x1,y1,z1, ...]
    # w_sin_ref: (3k, k*feat)    block-diag of weight.T[[0,2,4], :]
    # w_cos_ref: (3k, k*feat)    block-diag of weight.T[[1,3,5], :]
    # b_ref:     (1,  k*feat)    bias tiled k times (f32)
    # out_ref:   (TR, k*feat)
    p = pos_ref[...].astype(jnp.float32)
    # TODO(synk): sin and cos each lower with their own range reduction on the
    # VPU; a fused sincos would save ~1.5x VALU work but jnp has no primitive.
    mm_dtype = w_sin_ref.dtype
    sin_p = jnp.sin(p).astype(mm_dtype)
    cos_p = jnp.cos(p).astype(mm_dtype)
    out = jnp.dot(sin_p, w_sin_ref[...], preferred_element_type=jnp.float32)
    out = out + jnp.dot(cos_p, w_cos_ref[...], preferred_element_type=jnp.float32)
    out = out + b_ref[...]
    out_ref[...] = out.astype(out_ref.dtype)


@functools.partial(
    jax.jit, static_argnames=("tile_pts", "out_dtype", "matmul_dtype")
)
def positional_embedding_3d(point_pos, weight, bias, *, tile_pts=65536,
                            out_dtype=jnp.float32, matmul_dtype=jnp.float32):
    """point_pos: (B, n_pts, 3); weight: (feat_ch, 6) PyTorch layout; bias: (feat_ch,)."""
    B, n_pts, _ = point_pos.shape
    feat_ch = weight.shape[0]
    N = B * n_pts

    w32 = weight.astype(jnp.float32)
    b32 = bias.astype(jnp.float32)

    k, feat_pad = _packing_plan(feat_ch, N)
    n_rows = N // k
    rem = N - n_rows * k

    if n_rows < 8:
        # Too small to be worth a kernel launch.
        return _jnp_forward(point_pos.astype(jnp.float32), w32, b32).astype(out_dtype)

    w = w32
    b = b32
    if feat_pad != feat_ch:
        # Lane-dense fallback: widen the Linear with zero output columns,
        # sliced off after the kernel (rarely-hit path).
        w = jnp.pad(w, ((0, feat_pad - feat_ch), (0, 0)))
        b = jnp.pad(b, ((0, feat_pad - feat_ch),))

    pos_flat = point_pos.reshape(N, 3).astype(jnp.float32)
    pos_main = pos_flat if rem == 0 else pos_flat[: n_rows * k]
    pos_packed = pos_main.reshape(n_rows, 3 * k)          # free row-major reshape

    # Block-diagonal split weights: one MXU dot emits k packed points per row.
    w_t = w.T                                              # (6, feat_pad)
    eye_k = jnp.eye(k, dtype=jnp.float32)
    w_sin = jnp.kron(eye_k, w_t[0::2, :]).astype(matmul_dtype)   # (3k, k*feat_pad)
    w_cos = jnp.kron(eye_k, w_t[1::2, :]).astype(matmul_dtype)
    out_lanes = k * feat_pad
    b_row = jnp.tile(b, k).reshape(1, out_lanes)

    # ---- tile sizing --------------------------------------------------------
    out_itemsize = jnp.dtype(out_dtype).itemsize
    sub = 8 * (4 // out_itemsize)                          # 8 for f32, 16 for bf16
    in_row_bytes = _round_up(3 * k, 128) * 4
    out_row_bytes = _round_up(out_lanes, 128) * out_itemsize
    # 24 MiB double-buffered in+out tile budget: safe on v7x (64 MiB VMEM,
    # 32 MiB scoped default) and leaves headroom on v5e/v6e.
    tile_budget = 24 * 1024 * 1024
    rows_by_budget = max(sub, tile_budget // (2 * (in_row_bytes + out_row_bytes)))
    tile_rows = min(max(tile_pts // k, sub), rows_by_budget)
    # Keep the grid >= 2 blocks so the "parallel" axis splits across both v7x TCs.
    tile_rows = min(tile_rows, _round_up(_cdiv(n_rows, 2), sub))
    tile_rows = max(sub, (tile_rows // sub) * sub)
    grid = (_cdiv(n_rows, tile_rows),)

    weight_bytes = (2 * _round_up(3 * k, 8) * _round_up(out_lanes, 128)
                    * jnp.dtype(matmul_dtype).itemsize)
    footprint = 2 * tile_rows * (in_row_bytes + out_row_bytes) + 2 * weight_bytes
    vmem_limit = min(max(footprint + (2 << 20), 16 << 20), 32 << 20)

    out_packed = pl.pallas_call(
        _pos_emb_kernel,
        out_shape=jax.ShapeDtypeStruct((n_rows, out_lanes), out_dtype),
        grid_spec=pltpu.PrefetchScalarGridSpec(
            num_scalar_prefetch=0,
            grid=grid,
            in_specs=[
                pl.BlockSpec((tile_rows, 3 * k), lambda i: (i, 0)),
                pl.BlockSpec((3 * k, out_lanes), lambda i: (0, 0)),
                pl.BlockSpec((3 * k, out_lanes), lambda i: (0, 0)),
                pl.BlockSpec((1, out_lanes), lambda i: (0, 0)),
            ],
            out_specs=pl.BlockSpec((tile_rows, out_lanes), lambda i: (i, 0)),
        ),
        compiler_params=pltpu.CompilerParams(
            dimension_semantics=("parallel",),
            vmem_limit_bytes=vmem_limit,
        ),
    )(pos_packed, w_sin, w_cos, b_row)

    # Free reshape back to one point per row.
    out_flat = out_packed.reshape(n_rows * k, feat_pad)
    if feat_pad != feat_ch:
        out_flat = out_flat[:, :feat_ch]
    if rem:
        # <= k-1 leftover points: tiny unpacked jnp computation appended,
        # instead of padding the input and slicing the whole output.
        rem_out = _jnp_forward(pos_flat[n_rows * k:], w32, b32).astype(out_dtype)
        out_flat = jnp.concatenate([out_flat, rem_out], axis=0)
    return out_flat.reshape(B, n_pts, feat_ch).astype(out_dtype)


if __name__ == "__main__":
    key = jax.random.PRNGKey(0)
    k_pos, k_w, k_b = jax.random.split(key, 3)

    B, n_pts, feat_ch = 2, 200, 32

    point_pos = jax.random.uniform(
        k_pos, (B, n_pts, 3), dtype=jnp.float32, minval=-3.0, maxval=3.0
    )
    # Deterministic Linear(6, feat_ch) params (PyTorch default-style uniform init).
    bound = 1.0 / math.sqrt(6.0)
    weight = jax.random.uniform(
        k_w, (feat_ch, 6), dtype=jnp.float32, minval=-bound, maxval=bound
    )
    bias = jax.random.uniform(
        k_b, (feat_ch,), dtype=jnp.float32, minval=-bound, maxval=bound
    )

    # Main check: N divisible by the packing factor (pure kernel path).
    out = positional_embedding_3d(point_pos, weight, bias)
    out = jax.block_until_ready(out)
    ref = _jnp_forward(point_pos, weight, bias)
    assert out.shape == (B, n_pts, feat_ch), out.shape
    assert jnp.allclose(out, ref, atol=1e-5, rtol=1e-5), float(jnp.abs(out - ref).max())

    # Ragged check: N not divisible by any packing candidate (kernel + jnp remainder).
    n_pts2 = 201
    point_pos2 = jax.random.uniform(
        k_pos, (B, n_pts2, 3), dtype=jnp.float32, minval=-3.0, maxval=3.0
    )
    out2 = jax.block_until_ready(positional_embedding_3d(point_pos2, weight, bias))
    ref2 = _jnp_forward(point_pos2, weight, bias)
    assert out2.shape == (B, n_pts2, feat_ch), out2.shape
    assert jnp.allclose(out2, ref2, atol=1e-5, rtol=1e-5), float(jnp.abs(out2 - ref2).max())

    print("KERNEL_OK")
</pallas_src>

<mosaic_0001>
module attributes {stable_mosaic.version = 11 : i64} {
  func.func @_pos_emb_kernel(%arg0: i32, %arg1: memref<16x48xf32, #tpu.memory_space<vmem>>, %arg2: memref<48x512xf32, #tpu.memory_space<vmem>>, %arg3: memref<48x512xf32, #tpu.memory_space<vmem>>, %arg4: memref<1x512xf32, #tpu.memory_space<vmem>>, %arg5: memref<16x512xf32, #tpu.memory_space<vmem>>) attributes {dimension_semantics = [#tpu.dimension_semantics<parallel>], iteration_bounds = array<i64: 2>, scalar_prefetch = 0 : i64, scratch_operands = 0 : i64, tpu.core_type = #tpu.core_type<tc>, window_params = [{transform_indices = @transform_0, window_bounds = array<i64: 16, 48>}, {pipeline_mode = #tpu.pipeline_mode<synchronous>, transform_indices = @transform_1, window_bounds = array<i64: 48, 512>}, {pipeline_mode = #tpu.pipeline_mode<synchronous>, transform_indices = @transform_2, window_bounds = array<i64: 48, 512>}, {pipeline_mode = #tpu.pipeline_mode<synchronous>, transform_indices = @transform_3, window_bounds = array<i64: 1, 512>}, {transform_indices = @transform_4, window_bounds = array<i64: 16, 512>}]} {
    %c0 = arith.constant 0 : index
    %c0_0 = arith.constant 0 : index
    %0 = vector.load %arg1[%c0, %c0_0] : memref<16x48xf32, #tpu.memory_space<vmem>>, vector<16x48xf32>
    %1 = math.sin %0 : vector<16x48xf32>
    %2 = math.cos %0 : vector<16x48xf32>
    %c0_1 = arith.constant 0 : index
    %c0_2 = arith.constant 0 : index
    %3 = vector.load %arg2[%c0_1, %c0_2] : memref<48x512xf32, #tpu.memory_space<vmem>>, vector<48x512xf32>
    %cst = arith.constant dense<0.000000e+00> : vector<16x512xf32>
    %4 = tpu.matmul %1, %3, %cst {dimension_numbers = #tpu.dot_dimension_numbers<[1], [0], [0], [1], [0, 0, 1, 1], [], []>} : vector<16x48xf32>, vector<48x512xf32>, vector<16x512xf32> -> vector<16x512xf32>
    %c0_3 = arith.constant 0 : index
    %c0_4 = arith.constant 0 : index
    %5 = vector.load %arg3[%c0_3, %c0_4] : memref<48x512xf32, #tpu.memory_space<vmem>>, vector<48x512xf32>
    %cst_5 = arith.constant dense<0.000000e+00> : vector<16x512xf32>
    %6 = tpu.matmul %2, %5, %cst_5 {dimension_numbers = #tpu.dot_dimension_numbers<[1], [0], [0], [1], [0, 0, 1, 1], [], []>} : vector<16x48xf32>, vector<48x512xf32>, vector<16x512xf32> -> vector<16x512xf32>
    %7 = arith.addf %4, %6 : vector<16x512xf32>
    %c0_6 = arith.constant 0 : index
    %c0_7 = arith.constant 0 : index
    %8 = vector.load %arg4[%c0_6, %c0_7] : memref<1x512xf32, #tpu.memory_space<vmem>>, vector<1x512xf32>
    %9 = vector.broadcast %8 : vector<1x512xf32> to vector<16x512xf32>
    %10 = arith.addf %7, %9 : vector<16x512xf32>
    %c0_8 = arith.constant 0 : index
    %c0_9 = arith.constant 0 : index
    %11 = vector.load %arg5[%c0_8, %c0_9] : memref<16x512xf32, #tpu.memory_space<vmem>>, vector<16x512xf32>
    tpu.vector_store %arg5[%c0_8, %c0_9], %10 {strides = array<i32>} : memref<16x512xf32, #tpu.memory_space<vmem>>, vector<16x512xf32>,
    return
  }
  func.func @transform_0(%arg0: i32) -> (i32, i32) {
    %c0_i32 = arith.constant 0 : i32
    %c0_i32_0 = arith.constant 0 : i32
    return %arg0, %c0_i32 : i32, i32
  }
  func.func @transform_1(%arg0: i32) -> (i32, i32) {
    %c0_i32 = arith.constant 0 : i32
    %c0_i32_0 = arith.constant 0 : i32
    %c0_i32_1 = arith.constant 0 : i32
    return %c0_i32, %c0_i32_0 : i32, i32
  }
  func.func @transform_2(%arg0: i32) -> (i32, i32) {
    %c0_i32 = arith.constant 0 : i32
    %c0_i32_0 = arith.constant 0 : i32
    %c0_i32_1 = arith.constant 0 : i32
    return %c0_i32, %c0_i32_0 : i32, i32
  }
  func.func @transform_3(%arg0: i32) -> (i32, i32) {
    %c0_i32 = arith.constant 0 : i32
    %c0_i32_0 = arith.constant 0 : i32
    %c0_i32_1 = arith.constant 0 : i32
    return %c0_i32, %c0_i32_0 : i32, i32
  }
  func.func @transform_4(%arg0: i32) -> (i32, i32) {
    %c0_i32 = arith.constant 0 : i32
    %c0_i32_0 = arith.constant 0 : i32
    return %arg0, %c0_i32 : i32, i32
  }
}

</mosaic_0001>

<bundles_post_ra>
// kernel: tile.8
= control target key start
LH: loop header
LB: loop body
LE: loop exit
PB: predicated region body
PF: predicated region fallthrough
CT: control target
= control target key end

     0   :  { %s28_s0 = inlined_call_operand.vmem [shape: f32[32], index: 0, kind: input, shape index: {}]   ;;  %s29_s1 = inlined_call_operand.vmem [shape: f32[16,32], index: 1, kind: output, shape index: {}]  }
   0x1   :  { %v4_v0 = vld [vmem:[%s28_s0] ss:$0 sm:$0xff] }
   0x2   :  { %5 = vst [vmem:[%s29_s1] sm:$0xff] %v4_v0  ;;  %8 = vst [vmem:[%s29_s1 + $0x8] sm:$0xff] %v4_v0 }

// kernel: tile.9
= control target key start
LH: loop header
LB: loop body
LE: loop exit
PB: predicated region body
PF: predicated region fallthrough
CT: control target
= control target key end

     0   :  { %s57_s8 = smov 96   ;;  %vm3_vm0 = vcmask 261120   ;;  %s59_s15 = smov 64   ;;  %vm9_vm1 = vcmask 1048320   ;;  %vm15_vm2 = vcmask 785920   ;;  %vm21_vm3 = vcmask 523520   ;;  %s94_s0 = inlined_call_operand.vmem [shape: f32[16,32], index: 0, kind: input, shape index: {}]   ;;  %s95_s1 = inlined_call_operand.vmem [shape: f32[1,512], index: 1, kind: output, shape index: {}]  }
   0x1   :  { %v48_v0 = vld [vmem:[%s94_s0 + $0x3] ss:$4 sm:$0xf]   ;;  %v49_v1 = vld [vmem:[%s94_s0 + $0x2] ss:$4 sm:$0xf]  }
   0x2   :  { %7 = vrot.lane.b32.xlu0 %v48_v0, %s57_s8  ;;  %v50_v2 = vld [vmem:[%s94_s0 + $0x1] ss:$4 sm:$0xf]   ;;  %v2_v3 = vld [vmem:[%s94_s0] ss:$4 sm:$0xf]  }
   0x3   :  { %s58_s0 = smov 32   ;;  %4 = vst.msk [vmem:[#allocation0] ss:$8 sm:$0xf] %vm3_vm0, %v2_v3  }
   0x4   :  { %19 = vrot.lane.b32.xlu1 %v50_v2, %s58_s0 }
   0x6   :  { %13 = vrot.lane.b32.xlu0 %v49_v1, %s59_s15 }
  0x74   :  { %v8_v4 = vpop.permute.xlu0 %7  }
  0x75   :  { %10 = vst.msk [vmem:[#allocation0] ss:$8 sm:$0xf] %vm9_vm1, %v8_v4  }
  0x76   :  { %v20_v5 = vpop.permute.xlu1 %19  }
  0x78   :  { %v14_v6 = vpop.permute.xlu0 %13  }
  0x79   :  { %16 = vst.msk [vmem:[#allocation0] ss:$8 sm:$0xf] %vm15_vm2, %v14_v6  }
  0x7a   :  { %22 = vst.msk [vmem:[#allocation0] ss:$8 sm:$0xf] %vm21_vm3, %v20_v5  }
  0x81   :  { %v26_v7 = vld [vmem:[#allocation0] sm:$0x1]  ;;  %v30_v8 = vld [vmem:[#allocation0 + $0x8] sm:$0x1]  ;;  %v35_v9 = vld [vmem:[#allocation0 + $0x10] sm:$0x1] }
  0x82   :  { %28 = vst [vmem:[%s95_s1] sm:$0x1] %v26_v7  ;;  %51 = vst [vmem:[%s95_s1 + $0x1] sm:$0x1] %v30_v8  ;;  %v41_v10 = vld [vmem:[#allocation0 + $0x18] sm:$0x1] }
  0x83   :  { %52 = vst [vmem:[%s95_s1 + $0x2] sm:$0x1] %v35_v9  ;;  %53 = vst [vmem:[%s95_s1 + $0x3] sm:$0x1] %v41_v10 }

// kernel: positional_embedding_3d.1
= control target key start
LH: loop header
LB: loop body
LE: loop exit
PB: predicated region body
PF: predicated region fallthrough
CT: control target
= control target key end

     0   :  { %s1248_s15 = smov 0   ;;  %s1534_s0 = inlined_call_operand.vmem [shape: f32[25,48], index: 0, kind: input, shape index: {}]   ;;  %s1535_s1 = inlined_call_operand.vmem [shape: f32[48,512], index: 1, kind: input, shape index: {}]   ;;  %s1536_s2 = inlined_call_operand.vmem [shape: f32[48,512], index: 2, kind: input, shape index: {}]   ;;  %s1537_s3 = inlined_call_operand.vmem [shape: f32[1,512], index: 3, kind: input, shape index: {}]   ;;  %s1538_s4 = inlined_call_operand.vmem [shape: f32[25,512], index: 4, kind: output, shape index: {}]  }
   0x1 LB: > { %s1084_s16 = sadd.s32 4294967295, %s1214_s15   ;;  %p1088_p0 = scmp.ge.s32.totalorder %s1214_s15, 1  ;;  %s1214_s15 = sphi %s1248_s15, %s14_s15  }
   0x2   : > { %p163_p1 = scmp.lt.s32.totalorder %s1214_s15, 3 }
   0x4   : > { %p164_p2 = pnand %p1088_p0, %p163_p1 }
   0x5   : > { %v644_v0 = vld [vmem:[%s1536_s2 + $0x8] sm:$0xff] (!%p164_p2)  ;;  %v646_v2 = vld [vmem:[%s1536_s2 + $0x18] sm:$0xff] (!%p164_p2)  ;;  %s1089_s23 = sshll.u32 (!%p164_p2), %s1084_s16, 1  ;;  %v643_v5 = vld [vmem:[%s1536_s2] sm:$0xff] (!%p164_p2)  ;;  %v1216_v7 = vmov (!%p164_p2), 0.0  }
   0x6   : > { %167 = sbr.rel (%p164_p2) target bundleno = 331 (0x14b), region = 36  ;;  %v648_v1 = vld [vmem:[%s1536_s2 + $0x28] sm:$0xff] (!%p164_p2)  ;;  %v650_v4 = vld [vmem:[%s1536_s2 + $0x38] sm:$0xff] (!%p164_p2)  ;;  %v647_v6 = vld [vmem:[%s1536_s2 + $0x20] sm:$0xff] (!%p164_p2)  ;;  %738 = vmatprep.mubr.f32.mxu0 (!%p164_p2), %v1216_v7  ;;  %815 = vmatprep.mubr.f32.mxu1 (!%p164_p2), %v1216_v7  ;;  %p191_p3 = scmp.lt.s32.totalorder (!%p164_p2), %s1089_s23, 3 }
   0x7   : > { %v1121_v3 = vpack.c.bf16 (!%p164_p2), %v648_v1, %v644_v0  ;;  %v1133_v8 = vpack.c.bf16 (!%p164_p2), %v650_v4, %v646_v2  ;;  %v1123_v9 = vpack.c.bf16 (!%p164_p2), %v647_v6, %v643_v5  ;;  %v645_v10 = vld [vmem:[%s1536_s2 + $0x10] sm:$0xff] (!%p164_p2)  ;;  %v652_v12 = vld [vmem:[%s1536_s2 + $0x48] sm:$0xff] (!%p164_p2)  ;;  %v654_v15 = vld [vmem:[%s1536_s2 + $0x58] sm:$0xff] (!%p164_p2)  ;;  %v1217_v63 = vmov (!%p164_p2), 683565275  }
   0x8   : > { %v649_v11 = vld [vmem:[%s1536_s2 + $0x30] sm:$0xff] (!%p164_p2)  ;;  %v656_v14 = vld [vmem:[%s1536_s2 + $0x68] sm:$0xff] (!%p164_p2)  ;;  %v658_v16 = vld [vmem:[%s1536_s2 + $0x78] sm:$0xff] (!%p164_p2)  ;;  %v1218_v1 = vmov (!%p164_p2), 2475754826  }
   0x9   : > { %1122 = vmatprep.subr.bf16.mxu0 (!%p164_p2), %v1121_v3  ;;  %v1135_v13 = vpack.c.bf16 (!%p164_p2), %v649_v11, %v645_v10  ;;  %1134 = vmatprep.subr.bf16.mxu1 (!%p164_p2), %v1133_v8  ;;  %v1125_v17 = vpack.c.bf16 (!%p164_p2), %v656_v14, %v652_v12  ;;  %v1137_v18 = vpack.c.bf16 (!%p164_p2), %v658_v16, %v654_v15  ;;  %v651_v19 = vld [vmem:[%s1536_s2 + $0x40] sm:$0xff] (!%p164_p2)  ;;  %v653_v21 = vld [vmem:[%s1536_s2 + $0x50] sm:$0xff] (!%p164_p2)  ;;  %v660_v24 = vld [vmem:[%s1536_s2 + $0x88] sm:$0xff] (!%p164_p2)  ;;  %v1219_v3 = vmov (!%p164_p2), 2131351028  }
   0xa   : > { %1124 = vmatpush1.bf16.msra.mxu0 (!%p164_p2), %v1123_v9  ;;  %v655_v20 = vld [vmem:[%s1536_s2 + $0x60] sm:$0xff] (!%p164_p2)  ;;  %v657_v23 = vld [vmem:[%s1536_s2 + $0x70] sm:$0xff] (!%p164_p2)  ;;  %v664_v25 = vld [vmem:[%s1536_s2 + $0xa8] sm:$0xff] (!%p164_p2)  ;;  %v1220_v5 = vmov (!%p164_p2), 2102212464  }
   0xb   : > { %1136 = vmatpush1.bf16.msra.mxu1 (!%p164_p2), %v1135_v13  ;;  %v1127_v22 = vpack.c.bf16 (!%p164_p2), %v655_v20, %v651_v19  ;;  %1126 = vmatprep.subr.bf16.mxu0 (!%p164_p2), %v1125_v17  ;;  %v1139_v26 = vpack.c.bf16 (!%p164_p2), %v657_v23, %v653_v21  ;;  %v1129_v27 = vpack.c.bf16 (!%p164_p2), %v664_v25, %v660_v24  ;;  %v662_v28 = vld [vmem:[%s1536_s2 + $0x98] sm:$0xff] (!%p164_p2)  ;;  %v659_v30 = vld [vmem:[%s1536_s2 + $0x80] sm:$0xff] (!%p164_p2)  ;;  %v661_v33 = vld [vmem:[%s1536_s2 + $0x90] sm:$0xff] (!%p164_p2)  ;;  %v1221_v8 = vmov (!%p164_p2), 920167782  }
   0xc   : > { %1138 = vmatprep.subr.bf16.mxu1 (!%p164_p2), %v1137_v18  ;;  %v666_v29 = vld [vmem:[%s1536_s2 + $0xb8] sm:$0xff] (!%p164_p2)  ;;  %v663_v32 = vld [vmem:[%s1536_s2 + $0xa0] sm:$0xff] (!%p164_p2)  ;;  %v665_v34 = vld [vmem:[%s1536_s2 + $0xb0] sm:$0xff] (!%p164_p2)  ;;  %v1222_v16 = vmov (!%p164_p2), 1326507024  }
   0xd   : > { %s1542_s23 = smov (!%p191_p3, %s1089_s23), 3  ;;  %v1141_v31 = vpack.c.bf16 %v666_v29, %v662_v28  ;;  %v1131_v35 = vpack.c.bf16 %v663_v32, %v659_v30  ;;  %v620_v36 = vld [vmem:[%s1535_s1 + $0x8] sm:$0xff]  ;;  %v622_v38 = vld [vmem:[%s1535_s1 + $0x18] sm:$0xff]  ;;  %v1143_v39 = vpack.c.bf16 %v665_v34, %v661_v33 }
   0xe   : > { %s1090_s30 = sshll.u32 %s1542_s23, 3  ;;  %1128 = vmatpush1.bf16.msra.mxu0 %v1127_v22  ;;  %v624_v37 = vld [vmem:[%s1535_s1 + $0x28] sm:$0xff]  ;;  %v626_v41 = vld [vmem:[%s1535_s1 + $0x38] sm:$0xff]  ;;  %s1120_s24 = sshll.u32 %s1542_s23, 5 }
   0xf   : > { %s194_s13 = scalar_lea.vmem %s1534_s0, %s1090_s30  ;;  %1140 = vmatpush1.bf16.msra.mxu1 %v1139_v26  ;;  %1130 = vmatprep.subr.bf16.mxu0 %v1129_v27  ;;  %v1145_v40 = vpack.c.bf16 %v624_v37, %v620_v36  ;;  %v1157_v43 = vpack.c.bf16 %v626_v41, %v622_v38  ;;  %s201_s27 = scalar_lea.vmem %s1538_s4, %s1120_s24 }
  0x10   : > { %v1348_v42 = vld [vmem:[%s194_s13] sm:$0xff]  ;;  %1142 = vmatprep.subr.bf16.mxu1 %v1141_v31  ;;  %v1354_v49 = vld [vmem:[%s194_s13 + $0x8] sm:$0xff] }
  0x11   : > { %v205_v44 = vand.u32 2147483647, %v1348_v42  ;;  %v208_v45 = vand.u32 2139095040, %v1348_v42  ;;  %v309_v50 = vand.u32 2147483647, %v1354_v49  ;;  %v312_v51 = vand.u32 2139095040, %v1354_v49 }
  0x12   : > { %1132 = vmatpush1.bf16.msra.mxu0 %v1131_v35  ;;  %vm207_vm14 = vcmp.lt.s32.totalorder %v1348_v42, 0 }
  0x13   : > { %v209_v46 = vshrl.u32 %v208_v45, 23  ;;  %1144 = vmatpush1.bf16.msra.mxu1 %v1143_v39  ;;  %1146 = vmatprep.subr.bf16.mxu0 %v1145_v40  ;;  %v212_v47 = vand.u32 8388607, %v205_v44  ;;  %v313_v54 = vshrl.u32 %v312_v51, 23  ;;  %v316_v57 = vand.u32 8388607, %v309_v50 }
  0x14   : > { %1158 = vmatprep.subr.bf16.mxu1 %v1157_v43  ;;  %vm206_vm15 = vcmp.le.f32.partialorder %v205_v44, 0.7853982 }
  0x15   : > { %v1094_v48 = vadd.s32 4294967169, %v209_v46  ;;  %v213_v53 = vor.u32 8388608, %v212_v47  ;;  %v1098_v56 = vadd.s32 4294967169, %v313_v54  ;;  %v317_v10 = vor.u32 8388608, %v316_v57 }
  0x17   : > { %v215_v52 = vadd.s32 1, %v1094_v48  ;;  %v1360_v60 = vshll.u32 %v213_v53, 8  ;;  %v319_v61 = vadd.s32 1, %v1098_v56  ;;  %v357_v38 = vshll.u32 %v317_v10, 8 }
  0x19   : > { %vm216_vm0 = vcmp.gt.s32.totalorder %v215_v52, 0  ;;  %vm320_vm4 = vcmp.gt.s32.totalorder %v319_v61, 0 }
  0x1a   : > { %v217_v55 = vsel %vm216_vm0, %v215_v52, 0  ;;  %v321_v23 = vsel %vm320_vm4, %v319_v61, 0  ;;  %vm311_vm0 = vcmp.lt.s32.totalorder %v1354_v49, 0 }
  0x1b   : > { %v218_v58 = vshrl.u32 %v217_v55, 5  ;;  %v219_v59 = vand.u32 31, %v217_v55  ;;  %v322_v33 = vshrl.u32 %v321_v23, 5  ;;  %v323_v34 = vand.u32 31, %v321_v23 }
  0x1d   : > { %v220_v62 = vsub.s32 32, %v219_v59  ;;  %v222_v0 = vshll.u32 %v1217_v63, %v219_v59  ;;  %v225_v2 = vshll.u32 %v1218_v1, %v219_v59  ;;  %v228_v4 = vshll.u32 %v1219_v3, %v219_v59 }
  0x1e   : > { %v231_v6 = vshll.u32 %v1220_v5, %v219_v59  ;;  %v234_v9 = vshll.u32 %v1221_v8, %v219_v59  ;;  %vm237_vm1 = vcmp.lt.s32.totalorder %v218_v58, 1  ;;  %vm238_vm2 = vcmp.lt.s32.totalorder %v218_v58, 2 }
  0x1f   : > { %v221_v11 = vshrl.u32 %v1217_v63, %v220_v62  ;;  %v223_v12 = vshrl.u32 %v1218_v1, %v220_v62  ;;  %v226_v13 = vshrl.u32 %v1219_v3, %v220_v62  ;;  %v229_v14 = vshrl.u32 %v1220_v5, %v220_v62 }
  0x20   : > { %v232_v15 = vshrl.u32 %v1221_v8, %v220_v62  ;;  %v235_v17 = vshrl.u32 %v1222_v16, %v220_v62  ;;  %vm240_vm3 = vcmp.lt.s32.totalorder %v218_v58, 4  ;;  %vm239_vm5 = vcmp.lt.s32.totalorder %v218_v58, 3 }
  0x21   : > { %v224_v18 = vor.u32 %v223_v12, %v222_v0  ;;  %v227_v19 = vor.u32 %v226_v13, %v225_v2  ;;  %v230_v20 = vor.u32 %v229_v14, %v228_v4  ;;  %v324_v45 = vsub.s32 32, %v323_v34 }
  0x22   : > { %v233_v21 = vor.u32 %v232_v15, %v231_v6  ;;  %v236_v22 = vor.u32 %v235_v17, %v234_v9  ;;  %v326_v46 = vshll.u32 %v1217_v63, %v323_v34  ;;  %v329_v47 = vshll.u32 %v1218_v1, %v323_v34 }
  0x23   : > { %v241_v24 = vsel %vm237_vm1, %v221_v11, %v224_v18  ;;  %v242_v25 = vsel %vm240_vm3, %v230_v20, 2102212464  ;;  %v245_v26 = vsel %vm237_vm1, %v224_v18, %v227_v19  ;;  %v249_v27 = vsel %vm237_vm1, %v227_v19, %v230_v20 }
  0x24   : > { %v243_v28 = vsel %vm239_vm5, %v227_v19, %v242_v25  ;;  %v246_v29 = vsel %vm240_vm3, %v233_v21, 920167782  ;;  %v250_v30 = vsel %vm240_vm3, %v236_v22, 1326507024  ;;  %v332_v48 = vshll.u32 %v1219_v3, %v323_v34 }
  0x25   : > { %v247_v31 = vsel %vm239_vm5, %v230_v20, %v246_v29  ;;  %v251_v32 = vsel %vm239_vm5, %v233_v21, %v250_v30  ;;  %v244_v35 = vsel %vm238_vm2, %v241_v24, %v243_v28  ;;  %v335_v52 = vshll.u32 %v1220_v5, %v323_v34 }
  0x26   : > { %v248_v36 = vsel %vm238_vm2, %v245_v26, %v247_v31  ;;  %v252_v37 = vsel %vm238_vm2, %v249_v27, %v251_v32  ;;  %v260_v51 = vmul.u32 %v1360_v60, %v244_v35  ;;  %v338_v53 = vshll.u32 %v1221_v8, %v323_v34 }
  0x27   : > { %v1369_v39 = vmul.u32.u64.low %v1360_v60, %v252_v37  ;;  %v1370_v40 = vmul.u32.u64.high %v1360_v60, %v252_v37, %v1369_v39  ;;  %v1373_v41 = vmul.u32.u64.low %v1360_v60, %v248_v36  ;;  %v1374_v43 = vmul.u32.u64.high %v1360_v60, %v248_v36, %v1373_v41 }
  0x28   : > { %vm341_vm6 = vcmp.lt.s32.totalorder %v322_v33, 1  ;;  %v325_v54 = vshrl.u32 %v1217_v63, %v324_v45  ;;  %v327_v55 = vshrl.u32 %v1218_v1, %v324_v45  ;;  %v330_v56 = vshrl.u32 %v1219_v3, %v324_v45 }
  0x29   : > { %v333_v57 = vshrl.u32 %v1220_v5, %v324_v45  ;;  %vm262_vm7 = vc.u32 %v1370_v40, %v1373_v41  ;;  %v263_v58 = vadd.s32 1, %v1374_v43  ;;  %v336_v59 = vshrl.u32 %v1221_v8, %v324_v45 }
  0x2a   : > { %vm342_vm8 = vcmp.lt.s32.totalorder %v322_v33, 2  ;;  %v328_v61 = vor.u32 %v327_v55, %v326_v46  ;;  %v331_v62 = vor.u32 %v330_v56, %v329_v47  ;;  %v339_v2 = vshrl.u32 %v1222_v16, %v324_v45 }
  0x2b   : > { %v334_v0 = vor.u32 %v333_v57, %v332_v48  ;;  %v264_v4 = vsel %vm262_vm7, %v263_v58, %v1374_v43  ;;  %v337_v60 = vor.u32 %v336_v59, %v335_v52  ;;  %vm343_vm9 = vcmp.lt.s32.totalorder %v322_v33, 3 }
  0x2c   : > { %vm344_vm10 = vcmp.lt.s32.totalorder %v322_v33, 4  ;;  %v265_v6 = vadd.s32 %v264_v4, %v260_v51  ;;  %v340_v63 = vor.u32 %v339_v2, %v338_v53  ;;  %v345_v1 = vsel %vm341_vm6, %v325_v54, %v328_v61 }
  0x2d   : > { %v346_v3 = vsel %vm344_vm10, %v334_v0, 2102212464  ;;  %v349_v9 = vsel %vm341_vm6, %v328_v61, %v331_v62  ;;  %v350_v10 = vsel %vm344_vm10, %v337_v60, 920167782  ;;  %v353_v8 = vsel %vm341_vm6, %v331_v62, %v334_v0 }
  0x2e   : > { %v347_v5 = vsel %vm343_vm9, %v331_v62, %v346_v3  ;;  %v266_v11 = vadd.s32 536870912, %v265_v6  ;;  %v351_v12 = vsel %vm343_vm9, %v334_v0, %v350_v10  ;;  %v354_v13 = vsel %vm344_vm10, %v340_v63, 1326507024 }
  0x2f   : > { %v348_v14 = vsel %vm342_vm8, %v345_v1, %v347_v5  ;;  %v352_v15 = vsel %vm342_vm8, %v349_v9, %v351_v12  ;;  %v355_v16 = vsel %vm343_vm9, %v337_v60, %v354_v13  ;;  %v261_v36 = vadd.s32 %v1373_v41, %v1370_v40 }
  0x30   : > { %v267_v17 = vshrl.u32 %v266_v11, 30  ;;  %v356_v18 = vsel %vm342_vm8, %v353_v8, %v355_v16  ;;  %v1386_v19 = vmul.u32.u64.low %v357_v38, %v352_v15  ;;  %v1387_v20 = vmul.u32.u64.high %v357_v38, %v352_v15, %v1386_v19 }
  0x31   : > { %v1389_v21 = vmul.u32.u64.low %v357_v38, %v356_v18  ;;  %v1390_v22 = vmul.u32.u64.high %v357_v38, %v356_v18, %v1389_v21  ;;  %v364_v24 = vmul.u32 %v357_v38, %v348_v14  ;;  %vm1407_vm1 = vcmp.le.f32.partialorder %v309_v50, 0.7853982  ;;  %v623_v50 = vld [vmem:[%s1535_s1 + $0x20] sm:$0xff] }
  0x32   : > { %v268_v23 = vshll.u32 %v267_v17, 30  ;;  %v367_v26 = vadd.s32 1, %v1387_v20  ;;  %v291_v4 = vsub.s32 4, %v267_v17  ;;  %vm297_vm5 = vweird.f32 %v1348_v42 }
  0x33   : > { %vm366_vm11 = vc.u32 %v1390_v22, %v1386_v19  ;;  %v365_v59 = vadd.s32 %v1386_v19, %v1390_v22  ;;  %v619_v19 = vld [vmem:[%s1535_s1] sm:$0xff]  ;;  %vm667_vm6 = vcmask 392192  }
  0x34   : > { %v269_v25 = vsub.s32 %v265_v6, %v268_v23  ;;  %v368_v28 = vsel %vm366_vm11, %v367_v26, %v1387_v20  ;;  %v292_v9 = vsel %vm207_vm14, %v291_v4, %v267_v17  ;;  %v621_v23 = vld [vmem:[%s1535_s1 + $0x10] sm:$0xff] }
  0x35   : > { %v369_v29 = vadd.s32 %v368_v28, %v364_v24  ;;  %v294_v11 = vsel %vm206_vm15, 0, %v292_v9  ;;  %v625_v24 = vld [vmem:[%s1535_s1 + $0x30] sm:$0xff] }
  0x36   : > { %v271_v27 = vsub.s32 0, %v269_v25  ;;  %v506_v14 = vand.u32 3, %v294_v11 }
  0x37   : > { %v370_v31 = vadd.s32 536870912, %v369_v29 }
  0x38   : > { %v1095_v30 = vmin.u32 %v271_v27, %v269_v25  ;;  %vm511_vm2 = vcmp.eq.s32.totalorder %v506_v14, 2  ;;  %vm508_vm3 = vcmp.eq.s32.totalorder %v506_v14, 0  ;;  %v298_v27 = vadd.s32 3, %v294_v11 }
  0x39   : > { %v1395_v33 = vshrl.u32 %v370_v31, 30  ;;  %vm507_vm4 = vcmp.lt.s32.totalorder %v506_v14, 2  ;;  %v634_v31 = vld [vmem:[%s1535_s1 + $0x78] sm:$0xff] }
  0x3a   : > { %v273_v32 = vclz %v1095_v30  ;;  %v630_v30 = vld [vmem:[%s1535_s1 + $0x58] sm:$0xff] }
  0x3b   : > { %v372_v35 = vshll.u32 %v1395_v33, 30  ;;  %v395_v16 = vsub.s32 4, %v1395_v33 }
  0x3c   : > { %v1096_v34 = vadd.s32 4294967294, %v273_v32 }
  0x3d   : > { %v373_v38 = vsub.s32 %v369_v29, %v372_v35  ;;  %v396_v26 = vsel %vm311_vm0, %v395_v16, %v1395_v33  ;;  %v632_v29 = vld [vmem:[%s1535_s1 + $0x68] sm:$0xff]  ;;  %v1159_v35 = vpack.c.bf16 %v625_v24, %v621_v23 }
  0x3e   : > { %vm1097_vm12 = vcmp.lt.s32.totalorder %v1096_v34, 0 }
  0x3f   : > { %v276_v37 = vsel %vm1097_vm12, 0, %v1096_v34  ;;  %v375_v46 = vsub.s32 0, %v373_v38  ;;  %v1147_v34 = vpack.c.bf16 %v623_v50, %v619_v19 }
  0x40   : > { %v277_v39 = vsub.s32 32, %v276_v37  ;;  %v278_v43 = vshll.u32 %v269_v25, %v276_v37  ;;  %v281_v45 = vsub.s32 4294967266, %v276_v37  ;;  %v628_v25 = vld [vmem:[%s1535_s1 + $0x48] sm:$0xff]  ;;  %v631_v37 = vld [vmem:[%s1535_s1 + $0x60] sm:$0xff] }
  0x41   : > { %v1099_v51 = vmin.u32 %v375_v46, %v373_v38  ;;  %v629_v46 = vld [vmem:[%s1535_s1 + $0x50] sm:$0xff] }
  0x42   : > { %v279_v47 = vshrl.u32 %v261_v36, %v277_v39  ;;  %v282_v48 = vadd.s32 127, %v281_v45  ;;  %v627_v36 = vld [vmem:[%s1535_s1 + $0x40] sm:$0xff]  ;;  %v1161_v45 = vpack.c.bf16 %v634_v31, %v630_v30 }
  0x43   : > { %v377_v54 = vclz %v1099_v51  ;;  %v299_v51 = vand.u32 3, %v298_v27 }
  0x44   : > { %v280_v52 = vor.u32 %v279_v47, %v278_v43  ;;  %v283_v53 = vshll.u32 %v282_v48, 23  ;;  %v1149_v43 = vpack.c.bf16 %v632_v29, %v628_v25  ;;  %v633_v47 = vld [vmem:[%s1535_s1 + $0x70] sm:$0xff]  ;;  %v636_v48 = vld [vmem:[%s1535_s1 + $0x88] sm:$0xff] }
  0x45   : > { %v1100_v57 = vadd.s32 4294967294, %v377_v54  ;;  %v638_v54 = vld [vmem:[%s1535_s1 + $0x98] sm:$0xff]  ;;  %vm301_vm7 = vcmp.eq.s32.totalorder %v299_v51, 0  ;;  %vm304_vm8 = vcmp.eq.s32.totalorder %v299_v51, 2  ;;  %vm300_vm10 = vcmp.lt.s32.totalorder %v299_v51, 2 }
  0x46   : > { %v284_v55 = vor.u32 4788187, %v283_v53  ;;  %v287_v56 = vcvt.s32.f32 %v280_v52  ;;  %v640_v53 = vld [vmem:[%s1535_s1 + $0xa8] sm:$0xff] }
  0x47   : > { %vm1101_vm13 = vcmp.lt.s32.totalorder %v1100_v57, 0 }
  0x48   : > { %v285_v58 = vand.u32 2147483647, %v284_v55  ;;  %v380_v41 = vsel %vm1101_vm13, 0, %v1100_v57  ;;  %v642_v55 = vld [vmem:[%s1535_s1 + $0xb8] sm:$0xff]  ;;  %vm401_vm13 = vweird.f32 %v1354_v49 }
  0x49   : > { %v381_v61 = vsub.s32 32, %v380_v41  ;;  %v382_v62 = vshll.u32 %v373_v38, %v380_v41  ;;  %v385_v0 = vsub.s32 4294967266, %v380_v41  ;;  %v398_v38 = vsel %vm1407_vm1, 0, %v396_v26  ;;  %v639_v41 = vld [vmem:[%s1535_s1 + $0xa0] sm:$0xff] }
  0x4a   : > { %v288_v40 = vmul.f32 %v287_v56, %v285_v58  ;;  %v402_v56 = vadd.s32 3, %v398_v38  ;;  %v609_v57 = vand.u32 3, %v398_v38  ;;  %v1151_v58 = vpack.c.bf16 %v631_v37, %v627_v36 }
  0x4b   : > { %v383_v60 = vshrl.u32 %v365_v59, %v381_v61  ;;  %v386_v6 = vadd.s32 127, %v385_v0  ;;  %v1163_v59 = vpack.c.bf16 %v633_v47, %v629_v46  ;;  %v1153_v61 = vpack.c.bf16 %v640_v53, %v636_v48  ;;  %v637_v0 = vld [vmem:[%s1535_s1 + $0x90] sm:$0xff] }
  0x4c   : > { %v289_v2 = vxor.u32 2147483648, %v288_v40  ;;  %v403_v4 = vand.u32 3, %v402_v56  ;;  %vm614_vm9 = vcmp.eq.s32.totalorder %v609_v57, 2  ;;  %vm611_vm11 = vcmp.eq.s32.totalorder %v609_v57, 0 }
  0x4d   : > { %v384_v3 = vor.u32 %v383_v60, %v382_v62  ;;  %v387_v5 = vshll.u32 %v386_v6, 23  ;;  %v1165_v62 = vpack.c.bf16 %v642_v55, %v638_v54  ;;  %vm610_vm12 = vcmp.lt.s32.totalorder %v609_v57, 2 }
  0x4e   : > { %v290_v63 = vsel %vm207_vm14, %v289_v2, %v288_v40  ;;  %v635_v40 = vld [vmem:[%s1535_s1 + $0x80] sm:$0xff]  ;;  %v641_v2 = vld [vmem:[%s1535_s1 + $0xb0] sm:$0xff]  ;;  %vm405_vm14 = vcmp.eq.s32.totalorder %v403_v4, 0 }
  0x4f   : > { %v293_v1 = vsel %vm206_vm15, %v1348_v42, %v290_v63  ;;  %v388_v10 = vor.u32 4788187, %v387_v5  ;;  %v391_v8 = vcvt.s32.f32 %v384_v3  ;;  %v1155_v6 = vpack.c.bf16 %v639_v41, %v635_v40 }
  0x50   : > { %1200 = vcosq.f32 %v293_v1  ;;  %v1167_v3 = vpack.c.bf16 %v641_v2, %v637_v0  ;;  %vm408_vm15 = vcmp.eq.s32.totalorder %v403_v4, 2  ;;  %v990_v42 = vlaneseq }
  0x51   : > { %1202 = vsinq.f32 %v293_v1  ;;  %v389_v12 = vand.u32 2147483647, %v388_v10 }
  0x52   : > { %v991_v19 = vshrl.u32 %v990_v42, 7 }
  0x53   : > { %v392_v13 = vmul.f32 %v391_v8, %v389_v12 }
  0x54   : > { %v992_v50 = vsub.s32 0, %v991_v19  ;;  %v1004_v23 = vsub.s32 3, %v991_v19 }
  0x55   : > { %v393_v15 = vxor.u32 2147483648, %v392_v13 }
  0x57   : > { %v394_v17 = vsel %vm311_vm0, %v393_v15, %v392_v13  ;;  %vm404_vm0 = vcmp.lt.s32.totalorder %v403_v4, 2 }
  0x58   : > { %v397_v20 = vsel %vm1407_vm1, %v1354_v49, %v394_v17 }
  0x59   : > { %1204 = vcosq.f32 %v397_v20 }
  0x5a   : > { %v1414_v18 = vpop.eup %1200  ;;  %1206 = vsinq.f32 %v397_v20  ;;  %v1000_v20 = vsub.s32 2, %v991_v19 }
  0x5b   : > { %v1425_v21 = vpop.eup %1202  ;;  %v305_v22 = vxor.u32 2147483648, %v1414_v18 }
  0x5c   : > { %v302_v28 = vxor.u32 2147483648, %v1425_v21 }
  0x5d   : > { %v513_v32 = vsel %vm511_vm2, %v305_v22, %v1425_v21  ;;  %v306_v9 = vsel %vm304_vm8, %v305_v22, %v1425_v21  ;;  %v988_v21 = vld [vmem:[%s1537_s3] sm:$0xf]  ;;  %v996_v22 = vsub.s32 1, %v991_v19 }
  0x5e   : > { %v510_v33 = vsel %vm508_vm3, %v1414_v18, %v302_v28  ;;  %v303_v5 = vsel %vm301_vm7, %v1414_v18, %v302_v28  ;;  %v993_v24 = vrot.slane %v988_v21, %v992_v50  ;;  %v1005_v49 = vrot.slane %v988_v21, %v1004_v23 }
  0x5f   : > { %v514_v39 = vsel %vm507_vm4, %v510_v33, %v513_v32  ;;  %v307_v12 = vsel %vm300_vm10, %v303_v5, %v306_v9  ;;  %v997_v25 = vrot.slane %v988_v21, %v996_v22 }
  0x60   : > { %v515_v52 = vsel %vm297_vm5, nan, %v514_v39  ;;  %v308_v16 = vsel %vm297_vm5, nan, %v307_v12 }
  0x61   : > { %1110 = vmatmul.mubr.msk.f32.vlgmr.msra.gmra.mrb[0].mxu0 %vm667_vm6, %v515_v52  ;;  %1112 = vmatmul.mubr.msk.f32.vlgmr.msra.gmra.mrb[0].mxu1 %vm667_vm6, %v515_v52 }
  0x62   : > { %1148 = vmatpush1.bf16.msra.mxu0 %v1147_v34  ;;  %1160 = vmatpush1.bf16.msra.mxu1 %v1159_v35 }
  0x63   : > { %1150 = vmatprep.subr.bf16.mxu0 %v1149_v43  ;;  %1162 = vmatprep.subr.bf16.mxu1 %v1161_v45  ;;  %v1205_v60 = vpop.eup %1204 }
  0x64   : > { %744 = vmatprep.mubr.f32.mxu0 %v1216_v7  ;;  %821 = vmatprep.mubr.f32.mxu1 %v1216_v7  ;;  %v1207_v63 = vpop.eup %1206  ;;  %v409_v1 = vxor.u32 2147483648, %v1205_v60 }
  0x65   : > { %v406_v10 = vxor.u32 2147483648, %v1207_v63 }
  0x66   : > { %1152 = vmatpush1.bf16.msra.mxu0 %v1151_v58  ;;  %1164 = vmatpush1.bf16.msra.mxu1 %v1163_v59  ;;  %v616_v8 = vsel %vm614_vm9, %v409_v1, %v1207_v63  ;;  %v410_v15 = vsel %vm408_vm15, %v409_v1, %v1207_v63 }
  0x67   : > { %1154 = vmatprep.subr.bf16.mxu0 %v1153_v61  ;;  %1166 = vmatprep.subr.bf16.mxu1 %v1165_v62  ;;  %v613_v11 = vsel %vm611_vm11, %v1205_v60, %v406_v10  ;;  %v407_v44 = vsel %vm405_vm14, %v1205_v60, %v406_v10 }
  0x68   : > { %v617_v13 = vsel %vm610_vm12, %v613_v11, %v616_v8  ;;  %v411_v17 = vsel %vm404_vm0, %v407_v44, %v410_v15 }
  0x69   : > { %v618_v14 = vsel %vm401_vm13, nan, %v617_v13  ;;  %v412_v18 = vsel %vm401_vm13, nan, %v411_v17 }
  0x6a   : > { %1156 = vmatpush1.bf16.msra.mxu0 %v1155_v6  ;;  %1168 = vmatpush1.bf16.msra.mxu1 %v1167_v3 }
  0x6b   : > { %1111 = vmatmul.mubr.msk.f32.gmra.mrb[2].mxu0 %vm667_vm6, %v618_v14  ;;  %1113 = vmatmul.mubr.msk.f32.gmra.mrb[2].mxu1 %vm667_vm6, %v618_v14 }
  0x6c   : > { %898 = vmatprep.mubr.f32.mxu0 %v1216_v7  ;;  %975 = vmatprep.mubr.f32.mxu1 %v1216_v7 }
  0x6f   : > { %1114 = vmatmul.mubr.msk.f32.vlgmr.msra.gmra.mrb[0].mxu0 %vm667_vm6, %v308_v16  ;;  %1116 = vmatmul.mubr.msk.f32.vlgmr.msra.gmra.mrb[0].mxu1 %vm667_vm6, %v308_v16 }
  0x70   : > { %904 = vmatprep.mubr.f32.mxu0 %v1216_v7  ;;  %981 = vmatprep.mubr.f32.mxu1 %v1216_v7  ;;  %v1001_v7 = vrot.slane %v988_v21, %v1000_v20 }
  0x73   : > { %1115 = vmatmul.mubr.msk.f32.gmra.mrb[2].mxu0 %vm667_vm6, %v412_v18  ;;  %1117 = vmatmul.mubr.msk.f32.gmra.mrb[2].mxu1 %vm667_vm6, %v412_v18 }
 0x142   : > { %v900_v26 = vpop.f32.mrb[0].mxu0  ;;  %v977_v27 = vpop.f32.mrb[0].mxu1 }
 0x143   : > { %v1010_v28 = vadd.f32 %v993_v24, %v900_v26  ;;  %v1012_v29 = vadd.f32 %v1001_v7, %v977_v27  ;;  %v902_v30 = vpop.f32.mrb[1].mxu0  ;;  %v979_v31 = vpop.f32.mrb[1].mxu1 }
 0x144   : > { %v1011_v32 = vadd.f32 %v997_v25, %v902_v30  ;;  %v1013_v33 = vadd.f32 %v1005_v49, %v979_v31 }
 0x145   : > { %1018 = vst [vmem:[%s201_s27] sm:$0xff] %v1010_v28  ;;  %1020 = vst [vmem:[%s201_s27 + $0x10] sm:$0xff] %v1012_v29 }
 0x146   : > { %1019 = vst [vmem:[%s201_s27 + $0x8] sm:$0xff] %v1011_v32  ;;  %1021 = vst [vmem:[%s201_s27 + $0x18] sm:$0xff] %v1013_v33  ;;  %v906_v34 = vpop.f32.mrb[2].mxu0  ;;  %v983_v35 = vpop.f32.mrb[2].mxu1 }
 0x147   : > { %v1014_v36 = vadd.f32 %v993_v24, %v906_v34  ;;  %v1016_v37 = vadd.f32 %v1001_v7, %v983_v35  ;;  %v908_v38 = vpop.f32.mrb[3].mxu0  ;;  %v985_v39 = vpop.f32.mrb[3].mxu1 }
 0x148   : > { %v1015_v43 = vadd.f32 %v997_v25, %v908_v38  ;;  %v1017_v45 = vadd.f32 %v1005_v49, %v985_v39 }
 0x149   : > { %1022 = vst [vmem:[%s201_s27 + $0x20] sm:$0xff] %v1014_v36  ;;  %1024 = vst [vmem:[%s201_s27 + $0x30] sm:$0xff] %v1016_v37 }
 0x14a   : > { %1023 = vst [vmem:[%s201_s27 + $0x28] sm:$0xff] %v1015_v43  ;;  %1025 = vst [vmem:[%s201_s27 + $0x38] sm:$0xff] %v1017_v45 }
 0x14b PF: > { %s14_s15 = sadd.s32 1, %s1214_s15  }
 0x14c   : > { %p11_p4 = scmp.ge.s32.totalorder %s14_s15, 4  }
 0x14e   :  { %13 = sbr.rel (!%p11_p4) target bundleno = 1 (0x1), region = 66 }

</bundles_post_ra>
